<compile_context>
chip_gen: v7x
topology: tpu7x:2x2x1
jax: 0.10.0
libtpu: 0.0.40
codegen_flags: <defaults>
</compile_context>

<pallas_src>
import functools

import jax
import jax.numpy as jnp
from jax import lax
from jax.experimental import pallas as pl
from jax.experimental.pallas import tpu as pltpu

LN_EPS = 1e-12
_MATMUL_DTYPE = jnp.bfloat16  # MXU-native operand dtype; accumulation stays f32


def _round_down(x, m):
    return (x // m) * m


def _vmem_capacity_bytes() -> int:
    """Per-TensorCore VMEM capacity (v5e/v6e: 128 MiB, v7x: 64 MiB)."""
    try:
        return int(pltpu.get_tpu_info().vmem_capacity_bytes)
    except Exception:  # defensive fallback: assume the smallest (v7x per-TC)
        return 64 << 20


_VMEM_CAP_BYTES = _vmem_capacity_bytes()


def _bert_self_output_kernel(h_ref, x_ref, w_ref, p_ref, o_ref):
    """Fused dense + bias + (inference dropout = identity) + residual + LayerNorm.

    h_ref: (tm, H) tile of hidden_states (bf16 -> MXU operands)
    x_ref: (tm, H) tile of the residual input_tensor (native dtype)
    w_ref: (H, H)  dense weight, pre-transposed to (in, out); resident, single-buffered
    p_ref: (3, H)  packed f32 params: row0 = dense bias, row1 = gamma, row2 = beta
    o_ref: (tm, H) output tile
    """
    # MXU matmul in bf16 with f32 accumulation.
    y = jnp.dot(h_ref[...], w_ref[...], preferred_element_type=jnp.float32)

    # Bias + residual in f32. Dropout is identity in inference mode.
    # TODO(synk): training-mode dropout would need pltpu.prng_seed / prng_random_bits.
    y = y + p_ref[0:1, :] + x_ref[...].astype(jnp.float32)

    # LayerNorm over the last axis (biased variance, eps=1e-12), f32 math.
    # Two-pass (mean, then centered variance) kept for numerical stability.
    mean = jnp.mean(y, axis=-1, keepdims=True)
    centered = y - mean
    var = jnp.mean(centered * centered, axis=-1, keepdims=True)
    out = centered * lax.rsqrt(var + LN_EPS) * p_ref[1:2, :] + p_ref[2:3, :]

    o_ref[...] = out.astype(o_ref.dtype)


@functools.partial(jax.jit, static_argnames=("block_rows",))
def bert_self_output(hidden_states, input_tensor, w_t, bias, gamma, beta,
                     block_rows=512):
    """hidden_states, input_tensor: (B, S, H). w_t: (H, H) == torch weight.T."""
    B, S, H = hidden_states.shape
    M = B * S
    out_dtype = hidden_states.dtype

    # Cast the two dominant HBM streams (activations + weight) to bf16 inside
    # the wrapper; both operands share a dtype so jnp.dot stays on the bf16
    # MXU path (no silent f32 promotion). Residual stream keeps its dtype.
    h2 = hidden_states.reshape(M, H).astype(_MATMUL_DTYPE)
    w2 = w_t.astype(_MATMUL_DTYPE)
    x2 = input_tensor.reshape(M, H)

    # Pack bias / gamma / beta into a single (3, H) f32 array: one tiny DMA
    # and one resident VMEM buffer instead of three.
    params = jnp.stack([bias.astype(jnp.float32),
                        gamma.astype(jnp.float32),
                        beta.astype(jnp.float32)], axis=0)

    h_bytes = jnp.dtype(_MATMUL_DTYPE).itemsize
    x_bytes = x2.dtype.itemsize
    o_bytes = jnp.dtype(out_dtype).itemsize
    w_bytes = H * H * h_bytes

    def vmem_need(t):
        stream = 2 * t * H * (h_bytes + x_bytes + o_bytes)   # double-buffered tiles
        resident = w_bytes + 3 * H * 4                       # single-buffered weight + params
        ln_tmp = 3 * t * H * 4                               # f32 y / centered / out temporaries
        return stream + resident + ln_tmp

    # Per-TensorCore budget: the row grid is "parallel" so on v7x it shards
    # across both TCs, but each TC holds its own weight copy -> budget per-TC.
    budget = int(_VMEM_CAP_BYTES * 0.75)

    # --- Row-tile selection -------------------------------------------------
    sub = 16  # bf16 tiles pack as (16, 128); also a multiple of the f32 sublane (8)
    if M <= max(block_rows, sub):
        tm = M  # single full block; block_shape equal to the array dim is always legal
    else:
        tm = max(sub, _round_down(block_rows, sub))
        # Grow to 1024 rows when the budget allows (HBM-bound: bigger tiles win).
        while tm < 1024 and M >= 2 * tm and vmem_need(2 * tm) <= budget:
            tm *= 2
        # Shrink if over budget (e.g. very large H on v7x's 64 MiB per-TC VMEM).
        while tm > sub and vmem_need(tm) > budget:
            tm = max(sub, _round_down(tm // 2, sub))
        # Prefer a tile that divides M: all-full tiles and, crucially, no
        # wrapper-side jnp.pad (which would re-copy both activation tensors in HBM).
        if M % tm != 0:
            for cand in range(tm, max(sub, tm // 2) - 1, -sub):
                if M % cand == 0:
                    tm = cand
                    break
        # If no divisor was found, the last tile is partial: Pallas masks the
        # out-of-bounds rows on load/store, so no padding copy is ever made.
    # TODO(synk): for very large H (>= ~4K, or f32 weights) the resident (H, H)
    # weight should be tiled along its output columns; unnecessary for BERT sizes.

    grid = (pl.cdiv(M, tm),)
    vmem_limit = int(min(max(vmem_need(tm) + (4 << 20), 32 << 20), _VMEM_CAP_BYTES))

    cost = pl.CostEstimate(
        flops=2 * M * H * H + 8 * M * H,
        transcendentals=M,  # one rsqrt per row
        bytes_accessed=M * H * (h_bytes + x_bytes + o_bytes) + w_bytes + 3 * H * 4,
    )

    out2 = pl.pallas_call(
        _bert_self_output_kernel,
        out_shape=jax.ShapeDtypeStruct((M, H), out_dtype),
        grid_spec=pltpu.PrefetchScalarGridSpec(
            num_scalar_prefetch=0,
            grid=grid,
            in_specs=[
                pl.BlockSpec((tm, H), lambda i: (i, 0)),      # hidden tile (bf16)
                pl.BlockSpec((tm, H), lambda i: (i, 0)),      # residual tile
                pl.BlockSpec((H, H), lambda i: (0, 0),
                             pipeline_mode=pl.Buffered(1)),   # resident weight, single buffer
                pl.BlockSpec((3, H), lambda i: (0, 0),
                             pipeline_mode=pl.Buffered(1)),   # packed bias/gamma/beta
            ],
            out_specs=pl.BlockSpec((tm, H), lambda i: (i, 0)),
        ),
        compiler_params=pltpu.CompilerParams(
            dimension_semantics=("parallel",),
            vmem_limit_bytes=vmem_limit),
        cost_estimate=cost,
    )(h2, x2, w2, params)

    return out2.reshape(B, S, H)


if __name__ == "__main__":
    # Small synthetic config: batch=2, seq=8, hidden=32
    B, S, H = 2, 8, 32
    key = jax.random.PRNGKey(0)
    k1, k2, k3, k4 = jax.random.split(key, 4)

    hidden_states = jax.random.normal(k1, (B, S, H), dtype=jnp.float32)
    input_tensor = jax.random.normal(k2, (B, S, H), dtype=jnp.float32)

    # nn.Linear(H, H): weight (out, in), bias (out,). Deterministic init.
    bound = 1.0 / (H ** 0.5)
    weight = jax.random.uniform(k3, (H, H), minval=-bound, maxval=bound,
                                dtype=jnp.float32)
    bias = jax.random.uniform(k4, (H,), minval=-bound, maxval=bound,
                              dtype=jnp.float32)
    # LayerNorm(H): gamma=1, beta=0
    gamma = jnp.ones((H,), dtype=jnp.float32)
    beta = jnp.zeros((H,), dtype=jnp.float32)

    out = bert_self_output(hidden_states, input_tensor, weight.T, bias,
                           gamma, beta)
    jax.block_until_ready(out)

    # Reference in plain f32 JAX. The kernel uses bf16 matmul operands with f32
    # accumulation, so compare at a bf16-appropriate tolerance.
    y_ref = hidden_states @ weight.T + bias
    y_ref = y_ref + input_tensor
    mu = jnp.mean(y_ref, axis=-1, keepdims=True)
    var = jnp.mean((y_ref - mu) ** 2, axis=-1, keepdims=True)
    ref = (y_ref - mu) / jnp.sqrt(var + LN_EPS) * gamma + beta
    assert jnp.allclose(out, ref, atol=5e-2, rtol=5e-2), "mismatch vs reference"

    print("KERNEL_OK")
</pallas_src>

<mosaic_0001>
module attributes {stable_mosaic.version = 11 : i64} {
  func.func @_bert_self_output_kernel(%arg0: i32, %arg1: memref<16x32xbf16, #tpu.memory_space<vmem>>, %arg2: memref<16x32xf32, #tpu.memory_space<vmem>>, %arg3: memref<32x32xbf16, #tpu.memory_space<vmem>>, %arg4: memref<3x32xf32, #tpu.memory_space<vmem>>, %arg5: memref<16x32xf32, #tpu.memory_space<vmem>>) attributes {dimension_semantics = [#tpu.dimension_semantics<parallel>], iteration_bounds = array<i64: 1>, scalar_prefetch = 0 : i64, scratch_operands = 0 : i64, tpu.core_type = #tpu.core_type<tc>, window_params = [{transform_indices = @transform_0, window_bounds = array<i64: 16, 32>}, {transform_indices = @transform_1, window_bounds = array<i64: 16, 32>}, {pipeline_mode = #tpu.pipeline_mode<synchronous>, transform_indices = @transform_2, window_bounds = array<i64: 32, 32>}, {pipeline_mode = #tpu.pipeline_mode<synchronous>, transform_indices = @transform_3, window_bounds = array<i64: 3, 32>}, {transform_indices = @transform_4, window_bounds = array<i64: 16, 32>}]} {
    %c0 = arith.constant 0 : index
    %c0_0 = arith.constant 0 : index
    %0 = vector.load %arg1[%c0, %c0_0] : memref<16x32xbf16, #tpu.memory_space<vmem>>, vector<16x32xbf16>
    %c0_1 = arith.constant 0 : index
    %c0_2 = arith.constant 0 : index
    %1 = vector.load %arg3[%c0_1, %c0_2] : memref<32x32xbf16, #tpu.memory_space<vmem>>, vector<32x32xbf16>
    %cst = arith.constant dense<0.000000e+00> : vector<16x32xf32>
    %2 = tpu.matmul %0, %1, %cst {dimension_numbers = #tpu.dot_dimension_numbers<[1], [0], [0], [1], [0, 0, 1, 1], [], []>} : vector<16x32xbf16>, vector<32x32xbf16>, vector<16x32xf32> -> vector<16x32xf32>
    %c0_3 = arith.constant 0 : index
    %c0_4 = arith.constant 0 : index
    %3 = vector.load %arg4[%c0_3, %c0_4] : memref<3x32xf32, #tpu.memory_space<vmem>>, vector<1x32xf32>
    %4 = vector.broadcast %3 : vector<1x32xf32> to vector<16x32xf32>
    %5 = arith.addf %2, %4 : vector<16x32xf32>
    %c0_5 = arith.constant 0 : index
    %c0_6 = arith.constant 0 : index
    %6 = vector.load %arg2[%c0_5, %c0_6] : memref<16x32xf32, #tpu.memory_space<vmem>>, vector<16x32xf32>
    %7 = arith.addf %5, %6 : vector<16x32xf32>
    %cst_7 = arith.constant dense<0.000000e+00> : vector<16xf32>
    %8 = vector.multi_reduction <add>, %7, %cst_7 [1] : vector<16x32xf32> to vector<16xf32>
    %9 = vector.shape_cast %8 : vector<16xf32> to vector<16x1xf32>
    %cst_8 = arith.constant 3.200000e+01 : f32
    %10 = vector.broadcast %cst_8 : f32 to vector<16x1xf32>
    %11 = arith.divf %9, %10 : vector<16x1xf32>
    %12 = vector.broadcast %11 : vector<16x1xf32> to vector<16x32xf32>
    %13 = arith.subf %7, %12 : vector<16x32xf32>
    %14 = arith.mulf %13, %13 : vector<16x32xf32>
    %cst_9 = arith.constant dense<0.000000e+00> : vector<16xf32>
    %15 = vector.multi_reduction <add>, %14, %cst_9 [1] : vector<16x32xf32> to vector<16xf32>
    %16 = vector.shape_cast %15 : vector<16xf32> to vector<16x1xf32>
    %cst_10 = arith.constant 3.200000e+01 : f32
    %17 = vector.broadcast %cst_10 : f32 to vector<16x1xf32>
    %18 = arith.divf %16, %17 : vector<16x1xf32>
    %cst_11 = arith.constant 9.99999996E-13 : f32
    %19 = vector.broadcast %cst_11 : f32 to vector<16x1xf32>
    %20 = arith.addf %18, %19 : vector<16x1xf32>
    %21 = math.rsqrt %20 : vector<16x1xf32>
    %22 = vector.broadcast %21 : vector<16x1xf32> to vector<16x32xf32>
    %23 = arith.mulf %13, %22 : vector<16x32xf32>
    %c1 = arith.constant 1 : index
    %c0_12 = arith.constant 0 : index
    %24 = vector.load %arg4[%c1, %c0_12] : memref<3x32xf32, #tpu.memory_space<vmem>>, vector<1x32xf32>
    %25 = vector.broadcast %24 : vector<1x32xf32> to vector<16x32xf32>
    %26 = arith.mulf %23, %25 : vector<16x32xf32>
    %c2 = arith.constant 2 : index
    %c0_13 = arith.constant 0 : index
    %27 = vector.load %arg4[%c2, %c0_13] : memref<3x32xf32, #tpu.memory_space<vmem>>, vector<1x32xf32>
    %28 = vector.broadcast %27 : vector<1x32xf32> to vector<16x32xf32>
    %29 = arith.addf %26, %28 : vector<16x32xf32>
    %c0_14 = arith.constant 0 : index
    %c0_15 = arith.constant 0 : index
    %30 = vector.load %arg5[%c0_14, %c0_15] : memref<16x32xf32, #tpu.memory_space<vmem>>, vector<16x32xf32>
    tpu.vector_store %arg5[%c0_14, %c0_15], %29 {strides = array<i32>} : memref<16x32xf32, #tpu.memory_space<vmem>>, vector<16x32xf32>,
    return
  }
  func.func @transform_0(%arg0: i32) -> (i32, i32) {
    %c0_i32 = arith.constant 0 : i32
    %c0_i32_0 = arith.constant 0 : i32
    return %arg0, %c0_i32 : i32, i32
  }
  func.func @transform_1(%arg0: i32) -> (i32, i32) {
    %c0_i32 = arith.constant 0 : i32
    %c0_i32_0 = arith.constant 0 : i32
    return %arg0, %c0_i32 : i32, i32
  }
  func.func @transform_2(%arg0: i32) -> (i32, i32) {
    %c0_i32 = arith.constant 0 : i32
    %c0_i32_0 = arith.constant 0 : i32
    %c0_i32_1 = arith.constant 0 : i32
    return %c0_i32, %c0_i32_0 : i32, i32
  }
  func.func @transform_3(%arg0: i32) -> (i32, i32) {
    %c0_i32 = arith.constant 0 : i32
    %c0_i32_0 = arith.constant 0 : i32
    %c0_i32_1 = arith.constant 0 : i32
    return %c0_i32, %c0_i32_0 : i32, i32
  }
  func.func @transform_4(%arg0: i32) -> (i32, i32) {
    %c0_i32 = arith.constant 0 : i32
    %c0_i32_0 = arith.constant 0 : i32
    return %arg0, %c0_i32 : i32, i32
  }
}

</mosaic_0001>

<bundles_post_ra>
// kernel: bert_self_output.1
= control target key start
LH: loop header
LB: loop body
LE: loop exit
PB: predicated region body
PF: predicated region fallthrough
CT: control target
= control target key end

     0   :  { %v209_v1 = vmov 0.0   ;;  %vm210_vm0 = vmmov 0   ;;  %s282_s0 = inlined_call_operand.vmem [shape: bf16[16,32], index: 0, kind: input, shape index: {}]   ;;  %s283_s1 = inlined_call_operand.vmem [shape: f32[16,32], index: 1, kind: input, shape index: {}]   ;;  %s284_s2 = inlined_call_operand.vmem [shape: bf16[32,32], index: 2, kind: input, shape index: {}]   ;;  %s285_s3 = inlined_call_operand.vmem [shape: f32[3,32], index: 3, kind: input, shape index: {}]   ;;  %s286_s4 = inlined_call_operand.hbm [shape: f32[16,32], index: 4, kind: output, shape index: {}]  }
   0x1   :  { %v178_v0 = vld [vmem:[%s284_s2] sm:$0xff]   ;;  %165 = vmatprep.subr.bf16.mxu0 %v209_v1  ;;  %v179_v2 = vld [vmem:[%s284_s2 + $0x8] sm:$0xff]   ;;  %169 = vmatprep.mubr.msk.bf16.mxu0 %vm210_vm0, %v209_v1 }
   0x2   :  { %166 = vmatpush3.bf16.msra.mxu0 %v178_v0 }
   0x3   :  { %167 = vmatprep.subr.bf16.mxu0 %v209_v1 }
   0x4   :  { %9 = vsyncpa [#allocation3], 0  ;;  %v180_v3 = vld [vmem:[%s282_s0] sm:$0xff]   ;;  %vm47_vm1 = vcmask 261120   ;;  %v93_v10 = vld [vmem:[%s283_s1 + $0x8] sm:$0xff]  ;;  %s211_s28 = smov [#allocation2]  }
   0x5   :  { %v155_v4 = vld [vmem:[%s285_s3] ss:$0 sm:$0xff]  ;;  %v160_v34 = vld [vmem:[%s285_s3 + $0x1] ss:$0 sm:$0xff]  ;;  %v161_v36 = vld [vmem:[%s285_s3 + $0x2] ss:$0 sm:$0xff] }
   0x6   :  { %168 = vmatpush3.bf16.msra.mxu0 %v179_v2  ;;  %v92_v6 = vld [vmem:[%s283_s1] sm:$0xff]  ;;  %s144_s29 = sshll.u32 %s211_s28, 4  ;;  %s145_s29 = int_to_ptr.vmem [resolvable:$true] %s144_s29 }
   0x7   :  { %s185_s30 = scalar_lea.vmem %s145_s29, 256  ;;  %p190_p1 = scmp.lt.s32.totalorder %s145_s29, %s145_s29 }
   0x8   :  { %p186_p0 = scmp.ne.s32.totalorder %s145_s29, %s185_s30  ;;  %p191_p2 = scmp.lt.s32.totalorder %s185_s30, %s185_s30 }
   0x9   :  { %170 = vmatmul.mubr.msk.bf16.vlgmr.msra.gmra.mrb[0].mxu0 %vm47_vm1, %v180_v3 }
   0xa   :  { %p192_p3 = por %p191_p2, %p190_p1 }
   0xc   :  { %p193_p4 = pnand %p192_p3, %p186_p0 }
  0xdc   :  { %v85_v5 = vpop.f32.mrb[0].mxu0 }
  0xdd   :  { %v86_v7 = vadd.f32 %v155_v4, %v85_v5  ;;  %v171_v8 = vpop.f32.mrb[1].mxu0 }
  0xde   :  { %v88_v9 = vpop.f32.mrb[2].mxu0 }
  0xdf   :  { %v89_v11 = vadd.f32 %v155_v4, %v88_v9  ;;  %v172_v12 = vpop.f32.mrb[3].mxu0  ;;  %v94_v13 = vadd.f32 %v92_v6, %v86_v7 }
  0xe1   :  { %v96_v14 = vsel %vm47_vm1, %v94_v13, 0.0  ;;  %v95_v15 = vadd.f32 %v93_v10, %v89_v11 }
  0xe2   :  { %97 = vadd.xlane.f32.xlu0 %v96_v14 }
  0xe3   :  { %v99_v16 = vsel %vm47_vm1, %v95_v15, 0.0 }
  0xe6   :  { %100 = vadd.xlane.f32.xlu0 %v99_v16 }
 0x16f   :  { %v98_v17 = vpop.xlane.xlu0 %97 }
 0x170   :  { %v103_v18 = vmul.f32 0.03125, %v98_v17 }
 0x172   :  { %v105_v19 = vsub.f32 %v94_v13, %v103_v18 }
 0x173   :  { %v101_v20 = vpop.xlane.xlu0 %100 }
 0x174   :  { %v104_v21 = vmul.f32 0.03125, %v101_v20  ;;  %v107_v22 = vmul.f32 %v105_v19, %v105_v19 }
 0x176   :  { %v106_v23 = vsub.f32 %v95_v15, %v104_v21  ;;  %v109_v24 = vsel %vm47_vm1, %v107_v22, 0.0 }
 0x177   :  { %110 = vadd.xlane.f32.xlu1 %v109_v24 }
 0x178   :  { %v108_v25 = vmul.f32 %v106_v23, %v106_v23 }
 0x17a   :  { %v112_v26 = vsel %vm47_vm1, %v108_v25, 0.0 }
 0x17b   :  { %113 = vadd.xlane.f32.xlu1 %v112_v26 }
 0x204   :  { %v111_v27 = vpop.xlane.xlu1 %110 }
 0x205   :  { %v115_v28 = vmul.f32 0.03125, %v111_v27 }
 0x207   :  { %v117_v29 = vadd.f32 1e-12, %v115_v28 }
 0x208   :  { %v114_v30 = vpop.xlane.xlu1 %113 }
 0x209   :  { %181 = vrsqrt.f32 %v117_v29  ;;  %v116_v31 = vmul.f32 0.03125, %v114_v30 }
 0x20b   :  { %v118_v32 = vadd.f32 1e-12, %v116_v31 }
 0x20d   :  { %183 = vrsqrt.f32 %v118_v32 }
 0x213   :  { %v182_v33 = vpop.eup %181 }
 0x214   :  { %v121_v35 = vmul.f32 %v182_v33, %v105_v19 }
 0x216   :  { %v128_v37 = vmul.f32 %v160_v34, %v121_v35 }
 0x217   :  { %v184_v38 = vpop.eup %183 }
 0x218   :  { %v122_v39 = vmul.f32 %v184_v38, %v106_v23  ;;  %v135_v40 = vadd.f32 %v161_v36, %v128_v37 }
 0x21a   :  { %v129_v41 = vmul.f32 %v160_v34, %v122_v39  ;;  %137 = vst.msk [vmem:[#allocation2] sm:$0xff] %vm47_vm1, %v135_v40 }
 0x21c   :  { %v136_v42 = vadd.f32 %v161_v36, %v129_v41 }
 0x21e   :  { %138 = vst.msk [vmem:[#allocation2 + $0x8] sm:$0xff] %vm47_vm1, %v136_v42 }
 0x21f   :  { %196 = shalt.err (!%p193_p4)
}
 0x220   :  { %s197_s6 = scalar_lea.hbm %s286_s4, 256 }
 0x221   :  { %p198_p5 = scmp.ne.s32.totalorder %s286_s4, %s197_s6  ;;  %p201_p6 = scmp.lt.u32.totalorder %s197_s6, %s286_s4 }
 0x223   :  { %p203_p7 = pnand %p201_p6, %p198_p5 }
 0x225   :  { %206 = shalt.err (!%p203_p7)
}
 0x226   :  { %s212_s11 = smov 128   ;;  %s213_s12 = smov 8  }
 0x227   :  { %150 = dma.vmem_to_hbm [thread:$0]  %s145_s29, 256, %s286_s4, [#allocation3], %s212_s11, %s212_s11, %s213_s12  }
 0x228   :  { %207 = dma.done.wait [#allocation3], 256  }
 0x229   :  { %208 = vsyncadd [#allocation3], 4294967040 }
 0x22a   :  { %154 = vsyncpa [#allocation3], 1 }

</bundles_post_ra>
